<compile_context>
chip_gen: v5e
topology: v5e:2x2
jax: 0.10.0
libtpu: 0.0.40
codegen_flags: <defaults>
</compile_context>

<pallas_src>
import functools
import numpy as np
import jax
import jax.numpy as jnp
from jax.experimental import pallas as pl
from jax.experimental.pallas import tpu as pltpu


# ----------------------------------------------------------------------------
# trace-time constants: combined (H, W) 0/1 spread matrices
# ----------------------------------------------------------------------------
def _combined_spread(h, w, r):
    """s[rh*r+rw, hh*w+ww, (hh*r+rh)*(w*r) + (ww*r+rw)] = 1.

    Right-multiplying a (..., h*w) row-block by s[rh*r+rw] places its values at the
    (rh, rw) sub-pixel positions of a (..., h*r*w*r) lane-dense output plane."""
    ho, wo = h * r, w * r
    s = np.zeros((r * r, h * w, ho * wo), dtype=np.float32)
    hh = np.arange(h)[:, None]
    ww = np.arange(w)[None, :]
    rows = (hh * w + ww).ravel()
    for rh in range(r):
        for rw in range(r):
            cols = ((hh * r + rh) * wo + (ww * r + rw)).ravel()
            s[rh * r + rw, rows, cols] = 1.0
    return s


# ----------------------------------------------------------------------------
# Pallas kernel: one (batch, channel-group) volume per grid step
# ----------------------------------------------------------------------------
def _pixel_shuffle3d_kernel(x_ref, s_ref, o_ref, *, r, cb, d, h, w):
    # x_ref : (1, cb, r^3, d, h*w)    channels factored as (c_out, rd, rh, rw)
    # s_ref : (r^2, h*w, ho*wo)       combined spread matrices, one per (rh, rw)
    # o_ref : (1, cb, d, r*ho*wo)     rd slab occupies lanes [rd*ho*wo, (rd+1)*ho*wo)
    hw = h * w
    howo = hw * r * r
    for rd in range(r):                                   # r is a tiny compile-time int
        acc = None                                        # (cb*d, howo) f32
        for rh in range(r):
            for rw in range(r):
                cidx = (rd * r + rh) * r + rw
                xs = x_ref[0, :, cidx].reshape(cb * d, hw)            # free leading-dim merge
                t = jnp.dot(xs, s_ref[rh * r + rw],
                            preferred_element_type=jnp.float32)       # (cb*d, howo)
                acc = t if acc is None else acc + t                   # disjoint stripes
        # stream the finished rd slab straight into its lane-dense output window
        o_ref[0, :, :, rd * howo:(rd + 1) * howo] = (
            acc.reshape(cb, d, howo).astype(o_ref.dtype))


# ----------------------------------------------------------------------------
# wrapper
# ----------------------------------------------------------------------------
def _round_up(v, m):
    return (v + m - 1) // m * m


def _pick_channel_group(c_out, r, d, h, w, itemsize, budget_bytes):
    """Largest divisor CB of c_out whose tile-padded, double-buffered blocks plus the live
    f32 accumulator fit the budget."""
    hw = h * w
    howo = hw * r * r
    dp = _round_up(d, 8)
    spread_b = 2 * (r * r) * _round_up(hw, 8) * _round_up(howo, 128) * itemsize

    def footprint(cb):
        in_b = cb * (r ** 3) * dp * _round_up(hw, 128) * itemsize
        out_b = cb * dp * _round_up(r * howo, 128) * itemsize
        acc_b = 2 * cb * d * howo * 4          # live f32 accumulator + fresh matmul result
        return 2 * (in_b + out_b) + acc_b + spread_b    # x2: double-buffered streams

    for cb in range(c_out, 0, -1):
        if c_out % cb == 0 and footprint(cb) <= budget_bytes:
            return cb
    return 1


@functools.partial(jax.jit, static_argnames=("upscale_factor", "vmem_budget_bytes"))
def pixel_shuffle_3d(x, *, upscale_factor, vmem_budget_bytes=24 << 20):
    r = int(upscale_factor)
    b, c_in, d, h, w = x.shape
    assert c_in % (r ** 3) == 0, "channels must be divisible by upscale_factor**3"
    c_out = c_in // r ** 3
    ho, wo = h * r, w * r
    hw, howo = h * w, h * w * r * r

    if not jnp.issubdtype(x.dtype, jnp.floating):
        # TODO(synk): Pallas copy-based path for integer dtypes (v7x MXU has no int mode).
        return pixel_shuffle_3d_reference(x, r)

    itemsize = jnp.dtype(x.dtype).itemsize
    cb = _pick_channel_group(c_out, r, d, h, w, itemsize, vmem_budget_bytes)
    if b * (c_out // cb) < 2 and c_out > 1:
        # keep the parallel grid length >= 2 so both v7x TensorCores get work
        for cand in range(c_out // 2, 0, -1):
            if c_out % cand == 0:
                cb = cand
                break
    g = c_out // cb

    # free metadata reshapes: factor channels as (c_out, r^3), merge (H, W) into one lane axis
    x_r = x.reshape(b, c_out, r ** 3, d, hw)
    s = jnp.asarray(_combined_spread(h, w, r), dtype=x.dtype)      # (r^2, hw, ho*wo)

    kernel = functools.partial(_pixel_shuffle3d_kernel, r=r, cb=cb, d=d, h=h, w=w)
    out = pl.pallas_call(
        kernel,
        out_shape=jax.ShapeDtypeStruct((b, c_out, d, r * howo), x.dtype),
        grid=(b, g),
        in_specs=[
            pl.BlockSpec((1, cb, r ** 3, d, hw), lambda i, j: (i, j, 0, 0, 0)),
            pl.BlockSpec(s.shape, lambda i, j: (0, 0, 0)),          # resident constants
        ],
        out_specs=pl.BlockSpec((1, cb, d, r * howo), lambda i, j: (i, j, 0, 0)),
        compiler_params=pltpu.CompilerParams(
            dimension_semantics=("parallel", "parallel"),
            vmem_limit_bytes=32 << 20),                             # safe on v5e/v6e/v7x
    )(x_r, s)

    # free metadata reshape: (d, r*ho*wo) -> (d*r, ho, wo); flat index is identical.
    return out.reshape(b, c_out, d * r, ho, wo)


# ----------------------------------------------------------------------------
# pure-JAX reference (mirrors the PyTorch view/permute/view exactly)
# ----------------------------------------------------------------------------
def pixel_shuffle_3d_reference(x, upscale_factor):
    r = upscale_factor
    b, c_in, d, h, w = x.shape
    c = c_in // r ** 3
    y = x.reshape(b, c, r, r, r, d, h, w)
    y = jnp.transpose(y, (0, 1, 5, 2, 6, 3, 7, 4))
    return y.reshape(b, c, d * r, h * r, w * r)


# ----------------------------------------------------------------------------
if __name__ == "__main__":
    upscale = 2
    B, C_OUT, S = 2, 4, 8                      # input spatial 8^3, C_in = C_OUT * upscale^3 = 32
    C_IN = C_OUT * upscale ** 3

    x = jax.random.normal(jax.random.PRNGKey(0), (B, C_IN, S, S, S), jnp.float32)

    out = jax.block_until_ready(pixel_shuffle_3d(x, upscale_factor=upscale))

    ref = pixel_shuffle_3d_reference(x, upscale)
    assert out.shape == (B, C_OUT, S * upscale, S * upscale, S * upscale)
    max_diff = float(jnp.max(jnp.abs(out - ref)))
    assert np.isfinite(max_diff) and max_diff < 1e-5, f"mismatch vs reference: {max_diff}"

    print("KERNEL_OK")
</pallas_src>

<mosaic_0001>
module attributes {stable_mosaic.version = 11 : i64} {
  func.func @_pixel_shuffle3d_kernel(%arg0: i32, %arg1: i32, %arg2: memref<1x4x8x8x64xf32, #tpu.memory_space<vmem>>, %arg3: memref<4x64x256xf32, #tpu.memory_space<vmem>>, %arg4: memref<1x4x8x512xf32, #tpu.memory_space<vmem>>) attributes {dimension_semantics = [#tpu.dimension_semantics<parallel>, #tpu.dimension_semantics<parallel>], iteration_bounds = array<i64: 2, 1>, scalar_prefetch = 0 : i64, scratch_operands = 0 : i64, tpu.core_type = #tpu.core_type<tc>, window_params = [{transform_indices = @transform_0, window_bounds = array<i64: 1, 4, 8, 8, 64>}, {pipeline_mode = #tpu.pipeline_mode<synchronous>, transform_indices = @transform_1, window_bounds = array<i64: 4, 64, 256>}, {transform_indices = @transform_2, window_bounds = array<i64: 1, 4, 8, 512>}]} {
    %c0 = arith.constant 0 : index
    %c0_0 = arith.constant 0 : index
    %c0_1 = arith.constant 0 : index
    %c0_2 = arith.constant 0 : index
    %c0_3 = arith.constant 0 : index
    %0 = vector.load %arg2[%c0, %c0_0, %c0_1, %c0_2, %c0_3] : memref<1x4x8x8x64xf32, #tpu.memory_space<vmem>>, vector<1x4x1x8x64xf32>
    %1 = vector.shape_cast %0 : vector<1x4x1x8x64xf32> to vector<4x8x64xf32>
    %2 = vector.shape_cast %1 : vector<4x8x64xf32> to vector<32x64xf32>
    %c0_4 = arith.constant 0 : index
    %c0_5 = arith.constant 0 : index
    %c0_6 = arith.constant 0 : index
    %3 = vector.load %arg3[%c0_4, %c0_5, %c0_6] : memref<4x64x256xf32, #tpu.memory_space<vmem>>, vector<1x64x256xf32>
    %4 = vector.shape_cast %3 : vector<1x64x256xf32> to vector<64x256xf32>
    %cst = arith.constant dense<0.000000e+00> : vector<32x256xf32>
    %5 = tpu.matmul %2, %4, %cst {dimension_numbers = #tpu.dot_dimension_numbers<[1], [0], [0], [1], [0, 0, 1, 1], [], []>} : vector<32x64xf32>, vector<64x256xf32>, vector<32x256xf32> -> vector<32x256xf32>
    %c0_7 = arith.constant 0 : index
    %c0_8 = arith.constant 0 : index
    %c1 = arith.constant 1 : index
    %c0_9 = arith.constant 0 : index
    %c0_10 = arith.constant 0 : index
    %6 = vector.load %arg2[%c0_7, %c0_8, %c1, %c0_9, %c0_10] : memref<1x4x8x8x64xf32, #tpu.memory_space<vmem>>, vector<1x4x1x8x64xf32>
    %7 = vector.shape_cast %6 : vector<1x4x1x8x64xf32> to vector<4x8x64xf32>
    %8 = vector.shape_cast %7 : vector<4x8x64xf32> to vector<32x64xf32>
    %c1_11 = arith.constant 1 : index
    %c0_12 = arith.constant 0 : index
    %c0_13 = arith.constant 0 : index
    %9 = vector.load %arg3[%c1_11, %c0_12, %c0_13] : memref<4x64x256xf32, #tpu.memory_space<vmem>>, vector<1x64x256xf32>
    %10 = vector.shape_cast %9 : vector<1x64x256xf32> to vector<64x256xf32>
    %cst_14 = arith.constant dense<0.000000e+00> : vector<32x256xf32>
    %11 = tpu.matmul %8, %10, %cst_14 {dimension_numbers = #tpu.dot_dimension_numbers<[1], [0], [0], [1], [0, 0, 1, 1], [], []>} : vector<32x64xf32>, vector<64x256xf32>, vector<32x256xf32> -> vector<32x256xf32>
    %12 = arith.addf %5, %11 : vector<32x256xf32>
    %c0_15 = arith.constant 0 : index
    %c0_16 = arith.constant 0 : index
    %c2 = arith.constant 2 : index
    %c0_17 = arith.constant 0 : index
    %c0_18 = arith.constant 0 : index
    %13 = vector.load %arg2[%c0_15, %c0_16, %c2, %c0_17, %c0_18] : memref<1x4x8x8x64xf32, #tpu.memory_space<vmem>>, vector<1x4x1x8x64xf32>
    %14 = vector.shape_cast %13 : vector<1x4x1x8x64xf32> to vector<4x8x64xf32>
    %15 = vector.shape_cast %14 : vector<4x8x64xf32> to vector<32x64xf32>
    %c2_19 = arith.constant 2 : index
    %c0_20 = arith.constant 0 : index
    %c0_21 = arith.constant 0 : index
    %16 = vector.load %arg3[%c2_19, %c0_20, %c0_21] : memref<4x64x256xf32, #tpu.memory_space<vmem>>, vector<1x64x256xf32>
    %17 = vector.shape_cast %16 : vector<1x64x256xf32> to vector<64x256xf32>
    %cst_22 = arith.constant dense<0.000000e+00> : vector<32x256xf32>
    %18 = tpu.matmul %15, %17, %cst_22 {dimension_numbers = #tpu.dot_dimension_numbers<[1], [0], [0], [1], [0, 0, 1, 1], [], []>} : vector<32x64xf32>, vector<64x256xf32>, vector<32x256xf32> -> vector<32x256xf32>
    %19 = arith.addf %12, %18 : vector<32x256xf32>
    %c0_23 = arith.constant 0 : index
    %c0_24 = arith.constant 0 : index
    %c3 = arith.constant 3 : index
    %c0_25 = arith.constant 0 : index
    %c0_26 = arith.constant 0 : index
    %20 = vector.load %arg2[%c0_23, %c0_24, %c3, %c0_25, %c0_26] : memref<1x4x8x8x64xf32, #tpu.memory_space<vmem>>, vector<1x4x1x8x64xf32>
    %21 = vector.shape_cast %20 : vector<1x4x1x8x64xf32> to vector<4x8x64xf32>
    %22 = vector.shape_cast %21 : vector<4x8x64xf32> to vector<32x64xf32>
    %c3_27 = arith.constant 3 : index
    %c0_28 = arith.constant 0 : index
    %c0_29 = arith.constant 0 : index
    %23 = vector.load %arg3[%c3_27, %c0_28, %c0_29] : memref<4x64x256xf32, #tpu.memory_space<vmem>>, vector<1x64x256xf32>
    %24 = vector.shape_cast %23 : vector<1x64x256xf32> to vector<64x256xf32>
    %cst_30 = arith.constant dense<0.000000e+00> : vector<32x256xf32>
    %25 = tpu.matmul %22, %24, %cst_30 {dimension_numbers = #tpu.dot_dimension_numbers<[1], [0], [0], [1], [0, 0, 1, 1], [], []>} : vector<32x64xf32>, vector<64x256xf32>, vector<32x256xf32> -> vector<32x256xf32>
    %26 = arith.addf %19, %25 : vector<32x256xf32>
    %27 = vector.shape_cast %26 : vector<32x256xf32> to vector<4x8x256xf32>
    %c0_31 = arith.constant 0 : index
    %c0_32 = arith.constant 0 : index
    %c0_33 = arith.constant 0 : index
    %c0_34 = arith.constant 0 : index
    %28 = vector.load %arg4[%c0_31, %c0_32, %c0_33, %c0_34] : memref<1x4x8x512xf32, #tpu.memory_space<vmem>>, vector<1x4x8x256xf32>
    %29 = vector.shape_cast %28 : vector<1x4x8x256xf32> to vector<4x8x256xf32>
    %30 = vector.shape_cast %27 : vector<4x8x256xf32> to vector<1x4x8x256xf32>
    tpu.vector_store %arg4[%c0_31, %c0_32, %c0_33, %c0_34], %30 {strides = array<i32>} : memref<1x4x8x512xf32, #tpu.memory_space<vmem>>, vector<1x4x8x256xf32>,
    %c0_35 = arith.constant 0 : index
    %c0_36 = arith.constant 0 : index
    %c4 = arith.constant 4 : index
    %c0_37 = arith.constant 0 : index
    %c0_38 = arith.constant 0 : index
    %31 = vector.load %arg2[%c0_35, %c0_36, %c4, %c0_37, %c0_38] : memref<1x4x8x8x64xf32, #tpu.memory_space<vmem>>, vector<1x4x1x8x64xf32>
    %32 = vector.shape_cast %31 : vector<1x4x1x8x64xf32> to vector<4x8x64xf32>
    %33 = vector.shape_cast %32 : vector<4x8x64xf32> to vector<32x64xf32>
    %c0_39 = arith.constant 0 : index
    %c0_40 = arith.constant 0 : index
    %c0_41 = arith.constant 0 : index
    %34 = vector.load %arg3[%c0_39, %c0_40, %c0_41] : memref<4x64x256xf32, #tpu.memory_space<vmem>>, vector<1x64x256xf32>
    %35 = vector.shape_cast %34 : vector<1x64x256xf32> to vector<64x256xf32>
    %cst_42 = arith.constant dense<0.000000e+00> : vector<32x256xf32>
    %36 = tpu.matmul %33, %35, %cst_42 {dimension_numbers = #tpu.dot_dimension_numbers<[1], [0], [0], [1], [0, 0, 1, 1], [], []>} : vector<32x64xf32>, vector<64x256xf32>, vector<32x256xf32> -> vector<32x256xf32>
    %c0_43 = arith.constant 0 : index
    %c0_44 = arith.constant 0 : index
    %c5 = arith.constant 5 : index
    %c0_45 = arith.constant 0 : index
    %c0_46 = arith.constant 0 : index
    %37 = vector.load %arg2[%c0_43, %c0_44, %c5, %c0_45, %c0_46] : memref<1x4x8x8x64xf32, #tpu.memory_space<vmem>>, vector<1x4x1x8x64xf32>
    %38 = vector.shape_cast %37 : vector<1x4x1x8x64xf32> to vector<4x8x64xf32>
    %39 = vector.shape_cast %38 : vector<4x8x64xf32> to vector<32x64xf32>
    %c1_47 = arith.constant 1 : index
    %c0_48 = arith.constant 0 : index
    %c0_49 = arith.constant 0 : index
    %40 = vector.load %arg3[%c1_47, %c0_48, %c0_49] : memref<4x64x256xf32, #tpu.memory_space<vmem>>, vector<1x64x256xf32>
    %41 = vector.shape_cast %40 : vector<1x64x256xf32> to vector<64x256xf32>
    %cst_50 = arith.constant dense<0.000000e+00> : vector<32x256xf32>
    %42 = tpu.matmul %39, %41, %cst_50 {dimension_numbers = #tpu.dot_dimension_numbers<[1], [0], [0], [1], [0, 0, 1, 1], [], []>} : vector<32x64xf32>, vector<64x256xf32>, vector<32x256xf32> -> vector<32x256xf32>
    %43 = arith.addf %36, %42 : vector<32x256xf32>
    %c0_51 = arith.constant 0 : index
    %c0_52 = arith.constant 0 : index
    %c6 = arith.constant 6 : index
    %c0_53 = arith.constant 0 : index
    %c0_54 = arith.constant 0 : index
    %44 = vector.load %arg2[%c0_51, %c0_52, %c6, %c0_53, %c0_54] : memref<1x4x8x8x64xf32, #tpu.memory_space<vmem>>, vector<1x4x1x8x64xf32>
    %45 = vector.shape_cast %44 : vector<1x4x1x8x64xf32> to vector<4x8x64xf32>
    %46 = vector.shape_cast %45 : vector<4x8x64xf32> to vector<32x64xf32>
    %c2_55 = arith.constant 2 : index
    %c0_56 = arith.constant 0 : index
    %c0_57 = arith.constant 0 : index
    %47 = vector.load %arg3[%c2_55, %c0_56, %c0_57] : memref<4x64x256xf32, #tpu.memory_space<vmem>>, vector<1x64x256xf32>
    %48 = vector.shape_cast %47 : vector<1x64x256xf32> to vector<64x256xf32>
    %cst_58 = arith.constant dense<0.000000e+00> : vector<32x256xf32>
    %49 = tpu.matmul %46, %48, %cst_58 {dimension_numbers = #tpu.dot_dimension_numbers<[1], [0], [0], [1], [0, 0, 1, 1], [], []>} : vector<32x64xf32>, vector<64x256xf32>, vector<32x256xf32> -> vector<32x256xf32>
    %50 = arith.addf %43, %49 : vector<32x256xf32>
    %c0_59 = arith.constant 0 : index
    %c0_60 = arith.constant 0 : index
    %c7 = arith.constant 7 : index
    %c0_61 = arith.constant 0 : index
    %c0_62 = arith.constant 0 : index
    %51 = vector.load %arg2[%c0_59, %c0_60, %c7, %c0_61, %c0_62] : memref<1x4x8x8x64xf32, #tpu.memory_space<vmem>>, vector<1x4x1x8x64xf32>
    %52 = vector.shape_cast %51 : vector<1x4x1x8x64xf32> to vector<4x8x64xf32>
    %53 = vector.shape_cast %52 : vector<4x8x64xf32> to vector<32x64xf32>
    %c3_63 = arith.constant 3 : index
    %c0_64 = arith.constant 0 : index
    %c0_65 = arith.constant 0 : index
    %54 = vector.load %arg3[%c3_63, %c0_64, %c0_65] : memref<4x64x256xf32, #tpu.memory_space<vmem>>, vector<1x64x256xf32>
    %55 = vector.shape_cast %54 : vector<1x64x256xf32> to vector<64x256xf32>
    %cst_66 = arith.constant dense<0.000000e+00> : vector<32x256xf32>
    %56 = tpu.matmul %53, %55, %cst_66 {dimension_numbers = #tpu.dot_dimension_numbers<[1], [0], [0], [1], [0, 0, 1, 1], [], []>} : vector<32x64xf32>, vector<64x256xf32>, vector<32x256xf32> -> vector<32x256xf32>
    %57 = arith.addf %50, %56 : vector<32x256xf32>
    %58 = vector.shape_cast %57 : vector<32x256xf32> to vector<4x8x256xf32>
    %c0_67 = arith.constant 0 : index
    %c0_68 = arith.constant 0 : index
    %c0_69 = arith.constant 0 : index
    %c256 = arith.constant 256 : index
    %59 = vector.load %arg4[%c0_67, %c0_68, %c0_69, %c256] : memref<1x4x8x512xf32, #tpu.memory_space<vmem>>, vector<1x4x8x256xf32>
    %60 = vector.shape_cast %59 : vector<1x4x8x256xf32> to vector<4x8x256xf32>
    %61 = vector.shape_cast %58 : vector<4x8x256xf32> to vector<1x4x8x256xf32>
    tpu.vector_store %arg4[%c0_67, %c0_68, %c0_69, %c256], %61 {strides = array<i32>} : memref<1x4x8x512xf32, #tpu.memory_space<vmem>>, vector<1x4x8x256xf32>,
    return
  }
  func.func @transform_0(%arg0: i32, %arg1: i32) -> (i32, i32, i32, i32, i32) {
    %c0_i32 = arith.constant 0 : i32
    %c0_i32_0 = arith.constant 0 : i32
    %c0_i32_1 = arith.constant 0 : i32
    %c0_i32_2 = arith.constant 0 : i32
    return %arg0, %arg1, %c0_i32, %c0_i32_0, %c0_i32_1 : i32, i32, i32, i32, i32
  }
  func.func @transform_1(%arg0: i32, %arg1: i32) -> (i32, i32, i32) {
    %c0_i32 = arith.constant 0 : i32
    %c0_i32_0 = arith.constant 0 : i32
    %c0_i32_1 = arith.constant 0 : i32
    %c0_i32_2 = arith.constant 0 : i32
    return %c0_i32, %c0_i32_0, %c0_i32_1 : i32, i32, i32
  }
  func.func @transform_2(%arg0: i32, %arg1: i32) -> (i32, i32, i32, i32) {
    %c0_i32 = arith.constant 0 : i32
    %c0_i32_0 = arith.constant 0 : i32
    %c0_i32_1 = arith.constant 0 : i32
    return %arg0, %arg1, %c0_i32, %c0_i32_0 : i32, i32, i32, i32
  }
}

</mosaic_0001>

<bundles_post_ra>
// kernel: pixel_shuffle_3d.1
= control target key start
LH: loop header
LB: loop body
LE: loop exit
PB: predicated region body
PF: predicated region fallthrough
CT: control target
= control target key end

     0   :  { %s1327_s9 = smov 0   ;;  %s1329_s10 = smov 0   ;;  %s1934_s0 = inlined_call_operand.vmem [shape: f32[2,4,8,8,64], index: 0, kind: input, shape index: {}]   ;;  %s1935_s1 = inlined_call_operand.vmem [shape: f32[4,64,256], index: 1, kind: input, shape index: {}]   ;;  %s1936_s2 = inlined_call_operand.vmem [shape: f32[2,4,8,512], index: 2, kind: output, shape index: {}]  }
   0x1   :  { %s1331_s11 = smov 0  }
   0x2 LB: > { %s24_s12 = sadd.s32 1, %s1306_s10  ;;  %p1067_p0 = scmp.ge.s32.totalorder %s1310_s11, 1  ;;  %s1310_s11 = sphi %s1331_s11, %s12_s11   ;;  %s1306_s10 = sphi %s1329_s10, %s1944_s10   ;;  %s1302_s9 = sphi %s1327_s9, %s1943_s9  }
   0x3   : > { %p26_p1 = scmp.ge.s32.totalorder %s24_s12, 2  ;;  %p134_p2 = scmp.lt.s32.totalorder %s1310_s11, 3 }
   0x5   : > { %s1946_s12 = smov (%p26_p1, %s24_s12), 0  ;;  %p135_p3 = pnand %p1067_p0, %p134_p2 }
   0x7   : > { %138 = sbr.rel (%p135_p3) target bundleno = 286 (0x11e), region = 28 }
   0xc   : > { %v1350_v0 = vld [vmem:[%s1935_s1 + $0xf0] sm:$0xff]  ;;  %v1355_v1 = vld [vmem:[%s1935_s1 + $0xf8] sm:$0xff]  ;;  %p167_p4 = scmp.lt.s32.totalorder %s1302_s9, 1  ;;  %v1373_v4 = vld [vmem:[%s1935_s1 + $0xe0] sm:$0xff]  ;;  %vm230_vm0 = vcmask 523264  }
   0xd   : > { %v1360_v2 = vld [vmem:[%s1935_s1 + $0x70] sm:$0xff]  ;;  %251 = vmatpush.msra.mxu0 %v1350_v0  ;;  %280 = vmatpush.msra.mxu1 %v1355_v1  ;;  %v1368_v3 = vld [vmem:[%s1935_s1 + $0x78] sm:$0xff]  ;;  %v1378_v5 = vld [vmem:[%s1935_s1 + $0xe8] sm:$0xff] }
   0xe   : > { %321 = vmatpush.msra.mxu2 %v1360_v2  ;;  %350 = vmatpush.msra.mxu3 %v1368_v3  ;;  %v1385_v6 = vld [vmem:[%s1935_s1 + $0x60] sm:$0xff]  ;;  %v1390_v7 = vld [vmem:[%s1935_s1 + $0x68] sm:$0xff]  ;;  %v1395_v8 = vld [vmem:[%s1935_s1 + $0xd0] sm:$0xff]  ;;  %s1948_s9 = smov (!%p167_p4, %s1302_s9), 1 }
   0xf   : > { %252 = vmatpush.msra.mxu0 %v1373_v4  ;;  %281 = vmatpush.msra.mxu1 %v1378_v5  ;;  %v1402_v9 = vld [vmem:[%s1935_s1 + $0xd8] sm:$0xff]  ;;  %v1407_v10 = vld [vmem:[%s1935_s1 + $0x50] sm:$0xff]  ;;  %v1419_v12 = vld [vmem:[%s1935_s1 + $0xc0] sm:$0xff]  ;;  %s1262_s5 = sshll.u32 %s1948_s9, 8 }
  0x10   : > { %v1412_v11 = vld [vmem:[%s1935_s1 + $0x58] sm:$0xff]  ;;  %322 = vmatpush.msra.mxu2 %v1385_v6  ;;  %351 = vmatpush.msra.mxu3 %v1390_v7  ;;  %v1424_v13 = vld [vmem:[%s1935_s1 + $0xc8] sm:$0xff]  ;;  %v1436_v14 = vld [vmem:[%s1935_s1 + $0x40] sm:$0xff]  ;;  %s1519_s24 = scalar_lea.vmem %s1934_s0, %s1262_s5 }
  0x11   : > { %253 = vmatpush.msra.mxu0 %v1395_v8  ;;  %282 = vmatpush.msra.mxu1 %v1402_v9  ;;  %v1441_v15 = vld [vmem:[%s1935_s1 + $0x48] sm:$0xff]  ;;  %v1448_v16 = vld [vmem:[%s1935_s1 + $0xb0] sm:$0xff]  ;;  %v1453_v17 = vld [vmem:[%s1935_s1 + $0xb8] sm:$0xff] }
  0x12   : > { %323 = vmatpush.msra.mxu2 %v1407_v10  ;;  %352 = vmatpush.msra.mxu3 %v1412_v11  ;;  %v1460_v18 = vld [vmem:[%s1935_s1 + $0x30] sm:$0xff]  ;;  %v1465_v19 = vld [vmem:[%s1935_s1 + $0x38] sm:$0xff]  ;;  %v1472_v20 = vld [vmem:[%s1935_s1 + $0xa0] sm:$0xff] }
  0x13   : > { %254 = vmatpush.msra.mxu0 %v1419_v12  ;;  %283 = vmatpush.msra.mxu1 %v1424_v13  ;;  %v1477_v21 = vld [vmem:[%s1935_s1 + $0xa8] sm:$0xff]  ;;  %v1485_v22 = vld [vmem:[%s1935_s1 + $0x20] sm:$0xff]  ;;  %v1497_v24 = vld [vmem:[%s1935_s1 + $0x90] sm:$0xff] }
  0x14   : > { %324 = vmatpush.msra.mxu2 %v1436_v14  ;;  %353 = vmatpush.msra.mxu3 %v1441_v15  ;;  %v1490_v23 = vld [vmem:[%s1935_s1 + $0x28] sm:$0xff]  ;;  %v1502_v25 = vld [vmem:[%s1935_s1 + $0x98] sm:$0xff]  ;;  %v1509_v26 = vld [vmem:[%s1935_s1 + $0x10] sm:$0xff] }
  0x15   : > { %255 = vmatpush.msra.mxu0 %v1448_v16  ;;  %284 = vmatpush.msra.mxu1 %v1453_v17  ;;  %v1514_v27 = vld [vmem:[%s1935_s1 + $0x18] sm:$0xff]  ;;  %v1526_v28 = vld [vmem:[%s1935_s1 + $0x80] sm:$0xff]  ;;  %v1531_v29 = vld [vmem:[%s1935_s1 + $0x88] sm:$0xff] }
  0x16   : > { %325 = vmatpush.msra.mxu2 %v1460_v18  ;;  %354 = vmatpush.msra.mxu3 %v1465_v19  ;;  %v1538_v30 = vld [vmem:[%s1935_s1] sm:$0xff]  ;;  %v1543_v31 = vld [vmem:[%s1935_s1 + $0x8] sm:$0xff]  ;;  %v1556_v34 = vld [vmem:[%s1935_s1 + $0x1f0] sm:$0xff] }
  0x17   : > { %256 = vmatpush.msra.mxu0 %v1472_v20  ;;  %285 = vmatpush.msra.mxu1 %v1477_v21  ;;  %v1072_v32 = vld [vmem:[%s1519_s24 + $0x8] sm:$0xff]  ;;  %v188_v33 = vld [vmem:[%s1519_s24] sm:$0xff]  ;;  %v1561_v35 = vld [vmem:[%s1935_s1 + $0x1f8] sm:$0xff] }
  0x18   : > { %326 = vmatpush.msra.mxu2 %v1485_v22  ;;  %355 = vmatpush.msra.mxu3 %v1490_v23  ;;  %v1568_v36 = vld [vmem:[%s1935_s1 + $0x170] sm:$0xff]  ;;  %v1573_v37 = vld [vmem:[%s1935_s1 + $0x178] sm:$0xff]  ;;  %v1580_v38 = vld [vmem:[%s1935_s1 + $0x1e0] sm:$0xff] }
  0x19   : > { %257 = vmatpush.msra.mxu0 %v1497_v24  ;;  %286 = vmatpush.msra.mxu1 %v1502_v25  ;;  %v1585_v39 = vld [vmem:[%s1935_s1 + $0x1e8] sm:$0xff]  ;;  %v1592_v40 = vld [vmem:[%s1935_s1 + $0x160] sm:$0xff]  ;;  %v1604_v42 = vld [vmem:[%s1935_s1 + $0x1d0] sm:$0xff] }
  0x1a   : > { %327 = vmatpush.msra.mxu2 %v1509_v26  ;;  %356 = vmatpush.msra.mxu3 %v1514_v27  ;;  %v1597_v41 = vld [vmem:[%s1935_s1 + $0x168] sm:$0xff]  ;;  %v1609_v43 = vld [vmem:[%s1935_s1 + $0x1d8] sm:$0xff]  ;;  %v1616_v44 = vld [vmem:[%s1935_s1 + $0x150] sm:$0xff] }
  0x1b   : > { %258 = vmatpush.msra.mxu0 %v1526_v28  ;;  %287 = vmatpush.msra.mxu1 %v1531_v29  ;;  %v1621_v45 = vld [vmem:[%s1935_s1 + $0x158] sm:$0xff]  ;;  %v1073_v46 = vld [vmem:[%s1519_s24 + $0x48] sm:$0xff]  ;;  %v189_v47 = vld [vmem:[%s1519_s24 + $0x40] sm:$0xff] }
  0x1c   : > { %328 = vmatpush.msra.mxu2 %v1538_v30  ;;  %357 = vmatpush.msra.mxu3 %v1543_v31  ;;  %v1634_v48 = vld [vmem:[%s1935_s1 + $0x1c0] sm:$0xff]  ;;  %v1639_v49 = vld [vmem:[%s1935_s1 + $0x1c8] sm:$0xff]  ;;  %v1658_v52 = vld [vmem:[%s1935_s1 + $0x1b0] sm:$0xff] }
  0x1d   : > { %1092 = vmatmul.msk.f32.vlgmr.msra.gmra.mxu0 %vm230_vm0, %v1072_v32  ;;  %1096 = vmatmul.msk.f32.vlgmr.msra.gmra.mxu1 %vm230_vm0, %v1072_v32  ;;  %v1646_v50 = vld [vmem:[%s1935_s1 + $0x140] sm:$0xff]  ;;  %v1651_v51 = vld [vmem:[%s1935_s1 + $0x148] sm:$0xff]  ;;  %v1663_v53 = vld [vmem:[%s1935_s1 + $0x1b8] sm:$0xff] }
  0x1e   : > { %1100 = vmatmul.msk.f32.vlgmr.msra.gmra.mxu2 %vm230_vm0, %v188_v33  ;;  %1104 = vmatmul.msk.f32.vlgmr.msra.gmra.mxu3 %vm230_vm0, %v188_v33  ;;  %v1670_v54 = vld [vmem:[%s1935_s1 + $0x130] sm:$0xff]  ;;  %v1675_v55 = vld [vmem:[%s1935_s1 + $0x138] sm:$0xff]  ;;  %v1682_v56 = vld [vmem:[%s1935_s1 + $0x1a0] sm:$0xff] }
  0x1f   : > { %513 = vmatpush.msrb.mxu2 %v1556_v34  ;;  %542 = vmatpush.msrb.mxu3 %v1561_v35  ;;  %v1687_v57 = vld [vmem:[%s1935_s1 + $0x1a8] sm:$0xff]  ;;  %v1694_v58 = vld [vmem:[%s1935_s1 + $0x120] sm:$0xff]  ;;  %v1712_v62 = vld [vmem:[%s1935_s1 + $0x190] sm:$0xff] }
  0x20   : > { %413 = vmatpush.msrb.mxu0 %v1568_v36  ;;  %442 = vmatpush.msrb.mxu1 %v1573_v37  ;;  %v1699_v59 = vld [vmem:[%s1935_s1 + $0x128] sm:$0xff]  ;;  %v190_v61 = vld [vmem:[%s1519_s24 + $0x80] sm:$0xff]  ;;  %1939 = vst [vmem:[#allocation2_spill] sm:$0xff] %v1712_v62  ;;  %v1717_v63 = vld [vmem:[%s1935_s1 + $0x198] sm:$0xff] }
  0x21   : > { %514 = vmatpush.msrb.mxu2 %v1580_v38  ;;  %543 = vmatpush.msrb.mxu3 %v1585_v39  ;;  %v1074_v60 = vld [vmem:[%s1519_s24 + $0x88] sm:$0xff]  ;;  %1940 = vst [vmem:[#allocation3_spill] sm:$0xff] %v1717_v63  ;;  %v1724_v32 = vld [vmem:[%s1935_s1 + $0x110] sm:$0xff]  ;;  %v1729_v33 = vld [vmem:[%s1935_s1 + $0x118] sm:$0xff] }
  0x22   : > { %414 = vmatpush.msrb.mxu0 %v1592_v40  ;;  %443 = vmatpush.msrb.mxu1 %v1597_v41 }
  0x23   : > { %515 = vmatpush.msrb.mxu2 %v1604_v42  ;;  %544 = vmatpush.msrb.mxu3 %v1609_v43 }
  0x24   : > { %415 = vmatpush.msrb.mxu0 %v1616_v44  ;;  %444 = vmatpush.msrb.mxu1 %v1621_v45 }
  0x25   : > { %1093 = vmatmul.msk.f32.gmra.mxu0 %vm230_vm0, %v1073_v46  ;;  %1097 = vmatmul.msk.f32.gmra.mxu1 %vm230_vm0, %v1073_v46  ;;  %v1736_v46 = vld [vmem:[%s1935_s1 + $0x180] sm:$0xff] }
  0x26   : > { %1101 = vmatmul.msk.f32.gmra.mxu2 %vm230_vm0, %v189_v47  ;;  %1105 = vmatmul.msk.f32.gmra.mxu3 %vm230_vm0, %v189_v47  ;;  %v1741_v47 = vld [vmem:[%s1935_s1 + $0x188] sm:$0xff] }
  0x27   : > { %516 = vmatpush.msrb.mxu2 %v1634_v48  ;;  %545 = vmatpush.msrb.mxu3 %v1639_v49 }
  0x28   : > { %416 = vmatpush.msrb.mxu0 %v1646_v50  ;;  %445 = vmatpush.msrb.mxu1 %v1651_v51 }
  0x29   : > { %517 = vmatpush.msrb.mxu2 %v1658_v52  ;;  %546 = vmatpush.msrb.mxu3 %v1663_v53 }
  0x2a   : > { %417 = vmatpush.msrb.mxu0 %v1670_v54  ;;  %446 = vmatpush.msrb.mxu1 %v1675_v55 }
  0x2b   : > { %518 = vmatpush.msrb.mxu2 %v1682_v56  ;;  %547 = vmatpush.msrb.mxu3 %v1687_v57 }
  0x2c   : > { %418 = vmatpush.msrb.mxu0 %v1694_v58  ;;  %447 = vmatpush.msrb.mxu1 %v1699_v59 }
  0x2d   : > { %1094 = vmatmul.msk.f32.gmra.mxu0 %vm230_vm0, %v1074_v60  ;;  %1098 = vmatmul.msk.f32.gmra.mxu1 %vm230_vm0, %v1074_v60  ;;  %v1748_v60 = vld [vmem:[%s1935_s1 + $0x100] sm:$0xff] }
  0x2e   : > { %1102 = vmatmul.msk.f32.gmra.mxu2 %vm230_vm0, %v190_v61  ;;  %1106 = vmatmul.msk.f32.gmra.mxu3 %vm230_vm0, %v190_v61  ;;  %v1753_v61 = vld [vmem:[%s1935_s1 + $0x108] sm:$0xff] }
  0x2f   : > { %519 = vmatpush.msrb.mxu2 %v1712_v62  ;;  %548 = vmatpush.msrb.mxu3 %v1717_v63  ;;  %v1075_v62 = vld [vmem:[%s1519_s24 + $0xc8] sm:$0xff]  ;;  %v191_v63 = vld [vmem:[%s1519_s24 + $0xc0] sm:$0xff] }
  0x30   : > { %419 = vmatpush.msrb.mxu0 %v1724_v32  ;;  %448 = vmatpush.msrb.mxu1 %v1729_v33 }
  0x31   : > { %520 = vmatpush.msrb.mxu2 %v1736_v46  ;;  %549 = vmatpush.msrb.mxu3 %v1741_v47 }
  0x32   : > { %420 = vmatpush.msrb.mxu0 %v1748_v60  ;;  %449 = vmatpush.msrb.mxu1 %v1753_v61 }
  0x33   : > { %711 = vmatpush.msra.mxu2 %v1360_v2  ;;  %740 = vmatpush.msra.mxu3 %v1368_v3  ;;  %v1109_v2 = vld [vmem:[%s1519_s24 + $0x50] sm:$0xff]  ;;  %v1137_v3 = vld [vmem:[%s1519_s24 + $0x58] sm:$0xff] }
  0x34   : > { %641 = vmatpush.msra.mxu0 %v1350_v0  ;;  %670 = vmatpush.msra.mxu1 %v1355_v1  ;;  %v1108_v0 = vld [vmem:[%s1519_s24 + $0x10] sm:$0xff]  ;;  %v1136_v1 = vld [vmem:[%s1519_s24 + $0x18] sm:$0xff] }
  0x35   : > { %1095 = vmatmul.msk.f32.gmra.mxu0 %vm230_vm0, %v1075_v62  ;;  %1099 = vmatmul.msk.f32.gmra.mxu1 %vm230_vm0, %v1075_v62 }
  0x36   : > { %1103 = vmatmul.msk.f32.gmra.mxu2 %vm230_vm0, %v191_v63  ;;  %1107 = vmatmul.msk.f32.gmra.mxu3 %vm230_vm0, %v191_v63 }
  0x37   : > { %712 = vmatpush.msra.mxu2 %v1385_v6  ;;  %741 = vmatpush.msra.mxu3 %v1390_v7  ;;  %v1111_v6 = vld [vmem:[%s1519_s24 + $0xd0] sm:$0xff]  ;;  %v1139_v7 = vld [vmem:[%s1519_s24 + $0xd8] sm:$0xff] }
  0x38   : > { %642 = vmatpush.msra.mxu0 %v1373_v4  ;;  %671 = vmatpush.msra.mxu1 %v1378_v5  ;;  %v1110_v4 = vld [vmem:[%s1519_s24 + $0x90] sm:$0xff]  ;;  %v1138_v5 = vld [vmem:[%s1519_s24 + $0x98] sm:$0xff] }
  0x39   : > { %713 = vmatpush.msra.mxu2 %v1407_v10  ;;  %742 = vmatpush.msra.mxu3 %v1412_v11  ;;  %v1168_v10 = vld [vmem:[%s1519_s24 + $0x28] sm:$0xff]  ;;  %v1164_v11 = vld [vmem:[%s1519_s24 + $0x20] sm:$0xff] }
  0x3a   : > { %643 = vmatpush.msra.mxu0 %v1395_v8  ;;  %672 = vmatpush.msra.mxu1 %v1402_v9  ;;  %v1941_v8 = vld [vmem:[#allocation2_spill] sm:$0xff]  ;;  %v1942_v9 = vld [vmem:[#allocation3_spill] sm:$0xff] }
  0x3b   : > { %714 = vmatpush.msra.mxu2 %v1436_v14  ;;  %743 = vmatpush.msra.mxu3 %v1441_v15  ;;  %v1170_v14 = vld [vmem:[%s1519_s24 + $0xa8] sm:$0xff]  ;;  %v1166_v15 = vld [vmem:[%s1519_s24 + $0xa0] sm:$0xff] }
  0x3c   : > { %644 = vmatpush.msra.mxu0 %v1419_v12  ;;  %673 = vmatpush.msra.mxu1 %v1424_v13  ;;  %v1169_v12 = vld [vmem:[%s1519_s24 + $0x68] sm:$0xff]  ;;  %v1165_v13 = vld [vmem:[%s1519_s24 + $0x60] sm:$0xff] }
  0x3d   : > { %1128 = vmatmul.msk.f32.vlgmr.msrb.gmra.mxu0 %vm230_vm0, %v1108_v0  ;;  %1132 = vmatmul.msk.f32.vlgmr.msrb.gmra.mxu1 %vm230_vm0, %v1108_v0 }
  0x3e   : > { %1156 = vmatmul.msk.f32.vlgmr.msrb.gmra.mxu2 %vm230_vm0, %v1136_v1  ;;  %1160 = vmatmul.msk.f32.vlgmr.msrb.gmra.mxu3 %vm230_vm0, %v1136_v1 }
  0x3f   : > { %715 = vmatpush.msra.mxu2 %v1460_v18  ;;  %744 = vmatpush.msra.mxu3 %v1465_v19  ;;  %v1204_v18 = vld [vmem:[%s1519_s24 + $0x30] sm:$0xff]  ;;  %v1232_v19 = vld [vmem:[%s1519_s24 + $0x38] sm:$0xff] }
  0x40   : > { %645 = vmatpush.msra.mxu0 %v1448_v16  ;;  %674 = vmatpush.msra.mxu1 %v1453_v17  ;;  %v1171_v16 = vld [vmem:[%s1519_s24 + $0xe8] sm:$0xff]  ;;  %v1167_v17 = vld [vmem:[%s1519_s24 + $0xe0] sm:$0xff] }
  0x41   : > { %716 = vmatpush.msra.mxu2 %v1485_v22  ;;  %745 = vmatpush.msra.mxu3 %v1490_v23  ;;  %v1206_v22 = vld [vmem:[%s1519_s24 + $0xb0] sm:$0xff]  ;;  %v1234_v23 = vld [vmem:[%s1519_s24 + $0xb8] sm:$0xff] }
  0x42   : > { %646 = vmatpush.msra.mxu0 %v1472_v20  ;;  %675 = vmatpush.msra.mxu1 %v1477_v21  ;;  %v1205_v20 = vld [vmem:[%s1519_s24 + $0x70] sm:$0xff]  ;;  %v1233_v21 = vld [vmem:[%s1519_s24 + $0x78] sm:$0xff] }
  0x43   : > { %717 = vmatpush.msra.mxu2 %v1509_v26  ;;  %746 = vmatpush.msra.mxu3 %v1514_v27 }
  0x44   : > { %647 = vmatpush.msra.mxu0 %v1497_v24  ;;  %676 = vmatpush.msra.mxu1 %v1502_v25  ;;  %v1207_v24 = vld [vmem:[%s1519_s24 + $0xf0] sm:$0xff]  ;;  %v1235_v25 = vld [vmem:[%s1519_s24 + $0xf8] sm:$0xff]  ;;  %s1263_s24 = sshll.u32 %s1948_s9, 7 }
  0x45   : > { %1129 = vmatmul.msk.f32.gmra.mxu0 %vm230_vm0, %v1109_v2  ;;  %1133 = vmatmul.msk.f32.gmra.mxu1 %vm230_vm0, %v1109_v2  ;;  %s1907_s30 = scalar_lea.vmem %s1936_s2, %s1263_s24 }
  0x46   : > { %1157 = vmatmul.msk.f32.gmra.mxu2 %vm230_vm0, %v1137_v3  ;;  %1161 = vmatmul.msk.f32.gmra.mxu3 %vm230_vm0, %v1137_v3 }
  0x47   : > { %718 = vmatpush.msra.mxu2 %v1538_v30  ;;  %747 = vmatpush.msra.mxu3 %v1543_v31 }
  0x48   : > { %648 = vmatpush.msra.mxu0 %v1526_v28  ;;  %677 = vmatpush.msra.mxu1 %v1531_v29 }
  0x49   : > { %901 = vmatpush.msrb.mxu2 %v1556_v34  ;;  %930 = vmatpush.msrb.mxu3 %v1561_v35 }
  0x4a   : > { %802 = vmatpush.msrb.mxu0 %v1568_v36  ;;  %831 = vmatpush.msrb.mxu1 %v1573_v37 }
  0x4b   : > { %902 = vmatpush.msrb.mxu2 %v1580_v38  ;;  %931 = vmatpush.msrb.mxu3 %v1585_v39 }
  0x4c   : > { %803 = vmatpush.msrb.mxu0 %v1592_v40  ;;  %832 = vmatpush.msrb.mxu1 %v1597_v41 }
  0x4d   : > { %1130 = vmatmul.msk.f32.gmra.mxu0 %vm230_vm0, %v1110_v4  ;;  %1134 = vmatmul.msk.f32.gmra.mxu1 %vm230_vm0, %v1110_v4 }
  0x4e   : > { %1158 = vmatmul.msk.f32.gmra.mxu2 %vm230_vm0, %v1138_v5  ;;  %1162 = vmatmul.msk.f32.gmra.mxu3 %vm230_vm0, %v1138_v5 }
  0x4f   : > { %903 = vmatpush.msrb.mxu2 %v1604_v42  ;;  %932 = vmatpush.msrb.mxu3 %v1609_v43 }
  0x50   : > { %804 = vmatpush.msrb.mxu0 %v1616_v44  ;;  %833 = vmatpush.msrb.mxu1 %v1621_v45 }
  0x51   : > { %904 = vmatpush.msrb.mxu2 %v1634_v48  ;;  %933 = vmatpush.msrb.mxu3 %v1639_v49 }
  0x52   : > { %805 = vmatpush.msrb.mxu0 %v1646_v50  ;;  %834 = vmatpush.msrb.mxu1 %v1651_v51 }
  0x53   : > { %905 = vmatpush.msrb.mxu2 %v1658_v52  ;;  %934 = vmatpush.msrb.mxu3 %v1663_v53 }
  0x54   : > { %806 = vmatpush.msrb.mxu0 %v1670_v54  ;;  %835 = vmatpush.msrb.mxu1 %v1675_v55 }
  0x55   : > { %1131 = vmatmul.msk.f32.gmra.mxu0 %vm230_vm0, %v1111_v6  ;;  %1135 = vmatmul.msk.f32.gmra.mxu1 %vm230_vm0, %v1111_v6 }
  0x56   : > { %1159 = vmatmul.msk.f32.gmra.mxu2 %vm230_vm0, %v1139_v7  ;;  %1163 = vmatmul.msk.f32.gmra.mxu3 %vm230_vm0, %v1139_v7 }
  0x57   : > { %906 = vmatpush.msrb.mxu2 %v1682_v56  ;;  %935 = vmatpush.msrb.mxu3 %v1687_v57 }
  0x58   : > { %807 = vmatpush.msrb.mxu0 %v1694_v58  ;;  %836 = vmatpush.msrb.mxu1 %v1699_v59 }
  0x59   : > { %907 = vmatpush.msrb.mxu2 %v1941_v8  ;;  %936 = vmatpush.msrb.mxu3 %v1942_v9 }
  0x5a   : > { %808 = vmatpush.msrb.mxu0 %v1724_v32  ;;  %837 = vmatpush.msrb.mxu1 %v1729_v33 }
  0x5b   : > { %908 = vmatpush.msrb.mxu2 %v1736_v46  ;;  %937 = vmatpush.msrb.mxu3 %v1741_v47 }
  0x5c   : > { %809 = vmatpush.msrb.mxu0 %v1748_v60  ;;  %838 = vmatpush.msrb.mxu1 %v1753_v61 }
  0x5d   : > { %1188 = vmatmul.msk.f32.vlgmr.msra.gmra.mxu0 %vm230_vm0, %v1168_v10  ;;  %1192 = vmatmul.msk.f32.vlgmr.msra.gmra.mxu1 %vm230_vm0, %v1168_v10 }
  0x5e   : > { %1196 = vmatmul.msk.f32.vlgmr.msra.gmra.mxu2 %vm230_vm0, %v1164_v11  ;;  %1200 = vmatmul.msk.f32.vlgmr.msra.gmra.mxu3 %vm230_vm0, %v1164_v11 }
  0x65   : > { %1189 = vmatmul.msk.f32.gmra.mxu0 %vm230_vm0, %v1169_v12  ;;  %1193 = vmatmul.msk.f32.gmra.mxu1 %vm230_vm0, %v1169_v12 }
  0x66   : > { %1197 = vmatmul.msk.f32.gmra.mxu2 %vm230_vm0, %v1165_v13  ;;  %1201 = vmatmul.msk.f32.gmra.mxu3 %vm230_vm0, %v1165_v13 }
  0x6d   : > { %1190 = vmatmul.msk.f32.gmra.mxu0 %vm230_vm0, %v1170_v14  ;;  %1194 = vmatmul.msk.f32.gmra.mxu1 %vm230_vm0, %v1170_v14 }
  0x6e   : > { %1198 = vmatmul.msk.f32.gmra.mxu2 %vm230_vm0, %v1166_v15  ;;  %1202 = vmatmul.msk.f32.gmra.mxu3 %vm230_vm0, %v1166_v15 }
  0x75   : > { %1191 = vmatmul.msk.f32.gmra.mxu0 %vm230_vm0, %v1171_v16  ;;  %1195 = vmatmul.msk.f32.gmra.mxu1 %vm230_vm0, %v1171_v16 }
  0x76   : > { %1199 = vmatmul.msk.f32.gmra.mxu2 %vm230_vm0, %v1167_v17  ;;  %1203 = vmatmul.msk.f32.gmra.mxu3 %vm230_vm0, %v1167_v17 }
  0x7d   : > { %1224 = vmatmul.msk.f32.vlgmr.msrb.gmra.mxu0 %vm230_vm0, %v1204_v18  ;;  %1228 = vmatmul.msk.f32.vlgmr.msrb.gmra.mxu1 %vm230_vm0, %v1204_v18 }
  0x7e   : > { %1252 = vmatmul.msk.f32.vlgmr.msrb.gmra.mxu2 %vm230_vm0, %v1232_v19  ;;  %1256 = vmatmul.msk.f32.vlgmr.msrb.gmra.mxu3 %vm230_vm0, %v1232_v19 }
  0x85   : > { %1225 = vmatmul.msk.f32.gmra.mxu0 %vm230_vm0, %v1205_v20  ;;  %1229 = vmatmul.msk.f32.gmra.mxu1 %vm230_vm0, %v1205_v20 }
  0x86   : > { %1253 = vmatmul.msk.f32.gmra.mxu2 %vm230_vm0, %v1233_v21  ;;  %1257 = vmatmul.msk.f32.gmra.mxu3 %vm230_vm0, %v1233_v21 }
  0x8d   : > { %1226 = vmatmul.msk.f32.gmra.mxu0 %vm230_vm0, %v1206_v22  ;;  %1230 = vmatmul.msk.f32.gmra.mxu1 %vm230_vm0, %v1206_v22 }
  0x8e   : > { %1254 = vmatmul.msk.f32.gmra.mxu2 %vm230_vm0, %v1234_v23  ;;  %1258 = vmatmul.msk.f32.gmra.mxu3 %vm230_vm0, %v1234_v23 }
  0x95   : > { %1227 = vmatmul.msk.f32.gmra.mxu0 %vm230_vm0, %v1207_v24  ;;  %1231 = vmatmul.msk.f32.gmra.mxu1 %vm230_vm0, %v1207_v24 }
  0x96   : > { %1255 = vmatmul.msk.f32.gmra.mxu2 %vm230_vm0, %v1235_v25  ;;  %1259 = vmatmul.msk.f32.gmra.mxu3 %vm230_vm0, %v1235_v25 }
  0x9a   : > { %v260_v26 = vpop.f32.mrf.mxu0  ;;  %v289_v27 = vpop.f32.mrf.mxu1 }
  0xa1   : > { %v330_v28 = vpop.f32.mrf.mxu2  ;;  %v359_v29 = vpop.f32.mrf.mxu3 }
  0xa2   : > { %v263_v30 = vpop.f32.mrf.mxu0  ;;  %v292_v31 = vpop.f32.mrf.mxu1  ;;  %v331_v48 = vadd.f32 %v330_v28, %v260_v26  ;;  %v360_v49 = vadd.f32 %v359_v29, %v289_v27 }
  0xa9   : > { %v333_v34 = vpop.f32.mrf.mxu2  ;;  %v362_v35 = vpop.f32.mrf.mxu3 }
  0xaa   : > { %v266_v36 = vpop.f32.mrf.mxu0  ;;  %v295_v37 = vpop.f32.mrf.mxu1  ;;  %v334_v58 = vadd.f32 %v333_v34, %v263_v30  ;;  %v363_v59 = vadd.f32 %v362_v35, %v292_v31 }
  0xb1   : > { %v336_v38 = vpop.f32.mrf.mxu2  ;;  %v365_v39 = vpop.f32.mrf.mxu3 }
  0xb2   : > { %v269_v40 = vpop.f32.mrf.mxu0  ;;  %v298_v41 = vpop.f32.mrf.mxu1  ;;  %v337_v0 = vadd.f32 %v336_v38, %v266_v36  ;;  %v366_v1 = vadd.f32 %v365_v39, %v295_v37 }
  0xb9   : > { %v339_v42 = vpop.f32.mrf.mxu2  ;;  %v368_v43 = vpop.f32.mrf.mxu3 }
  0xba   : > { %v422_v44 = vpop.f32.mrf.mxu0  ;;  %v451_v45 = vpop.f32.mrf.mxu1  ;;  %v340_v10 = vadd.f32 %v339_v42, %v269_v40  ;;  %v369_v11 = vadd.f32 %v368_v43, %v298_v41 }
  0xbb   : > { %v463_v50 = vadd.f32 %v422_v44, %v331_v48  ;;  %v464_v51 = vadd.f32 %v451_v45, %v360_v49 }
  0xc1   : > { %v522_v52 = vpop.f32.mrf.mxu2  ;;  %v551_v53 = vpop.f32.mrf.mxu3 }
  0xc2   : > { %v563_v54 = vadd.f32 %v522_v52, %v463_v50  ;;  %v564_v55 = vadd.f32 %v551_v53, %v464_v51  ;;  %v425_v56 = vpop.f32.mrf.mxu0  ;;  %v454_v57 = vpop.f32.mrf.mxu1 }
  0xc3   : > { %v465_v62 = vadd.f32 %v425_v56, %v334_v58  ;;  %v466_v63 = vadd.f32 %v454_v57, %v363_v59 }
  0xc4   : > { %571 = vst [vmem:[%s1907_s30] sm:$0xff] %v563_v54 }
  0xc5   : > { %572 = vst [vmem:[%s1907_s30 + $0x8] sm:$0xff] %v564_v55 }
  0xc9   : > { %v525_v32 = vpop.f32.mrf.mxu2  ;;  %v554_v33 = vpop.f32.mrf.mxu3 }
  0xca   : > { %v565_v46 = vadd.f32 %v525_v32, %v465_v62  ;;  %v566_v47 = vadd.f32 %v554_v33, %v466_v63  ;;  %v428_v60 = vpop.f32.mrf.mxu0  ;;  %v457_v61 = vpop.f32.mrf.mxu1 }
  0xcb   : > { %v467_v2 = vadd.f32 %v428_v60, %v337_v0  ;;  %v468_v3 = vadd.f32 %v457_v61, %v366_v1 }
  0xcc   : > { %573 = vst [vmem:[%s1907_s30 + $0x20] sm:$0xff] %v565_v46 }
  0xcd   : > { %574 = vst [vmem:[%s1907_s30 + $0x28] sm:$0xff] %v566_v47 }
  0xd1   : > { %v528_v4 = vpop.f32.mrf.mxu2  ;;  %v557_v5 = vpop.f32.mrf.mxu3 }
  0xd2   : > { %v567_v6 = vadd.f32 %v528_v4, %v467_v2  ;;  %v568_v7 = vadd.f32 %v557_v5, %v468_v3  ;;  %v431_v8 = vpop.f32.mrf.mxu0  ;;  %v460_v9 = vpop.f32.mrf.mxu1 }
  0xd3   : > { %v469_v12 = vadd.f32 %v431_v8, %v340_v10  ;;  %v470_v13 = vadd.f32 %v460_v9, %v369_v11 }
  0xd4   : > { %575 = vst [vmem:[%s1907_s30 + $0x40] sm:$0xff] %v567_v6 }
  0xd5   : > { %576 = vst [vmem:[%s1907_s30 + $0x48] sm:$0xff] %v568_v7 }
  0xd9   : > { %v531_v14 = vpop.f32.mrf.mxu2  ;;  %v560_v15 = vpop.f32.mrf.mxu3 }
  0xda   : > { %v569_v16 = vadd.f32 %v531_v14, %v469_v12  ;;  %v570_v17 = vadd.f32 %v560_v15, %v470_v13  ;;  %v650_v18 = vpop.f32.mrf.mxu0  ;;  %v679_v19 = vpop.f32.mrf.mxu1 }
  0xdc   : > { %577 = vst [vmem:[%s1907_s30 + $0x60] sm:$0xff] %v569_v16 }
  0xdd   : > { %578 = vst [vmem:[%s1907_s30 + $0x68] sm:$0xff] %v570_v17 }
  0xe1   : > { %v720_v20 = vpop.f32.mrf.mxu2  ;;  %v749_v21 = vpop.f32.mrf.mxu3 }
  0xe2   : > { %v653_v22 = vpop.f32.mrf.mxu0  ;;  %v682_v23 = vpop.f32.mrf.mxu1  ;;  %v721_v38 = vadd.f32 %v720_v20, %v650_v18  ;;  %v750_v39 = vadd.f32 %v749_v21, %v679_v19 }
  0xe9   : > { %v723_v24 = vpop.f32.mrf.mxu2  ;;  %v752_v25 = vpop.f32.mrf.mxu3 }
  0xea   : > { %v656_v26 = vpop.f32.mrf.mxu0  ;;  %v685_v27 = vpop.f32.mrf.mxu1  ;;  %v724_v50 = vadd.f32 %v723_v24, %v653_v22  ;;  %v753_v51 = vadd.f32 %v752_v25, %v682_v23 }
  0xf1   : > { %v726_v28 = vpop.f32.mrf.mxu2  ;;  %v755_v29 = vpop.f32.mrf.mxu3 }
  0xf2   : > { %v659_v30 = vpop.f32.mrf.mxu0  ;;  %v688_v31 = vpop.f32.mrf.mxu1  ;;  %v727_v62 = vadd.f32 %v726_v28, %v656_v26  ;;  %v756_v63 = vadd.f32 %v755_v29, %v685_v27 }
  0xf9   : > { %v729_v34 = vpop.f32.mrf.mxu2  ;;  %v758_v35 = vpop.f32.mrf.mxu3 }
  0xfa   : > { %v811_v36 = vpop.f32.mrf.mxu0  ;;  %v840_v37 = vpop.f32.mrf.mxu1  ;;  %v730_v2 = vadd.f32 %v729_v34, %v659_v30  ;;  %v759_v3 = vadd.f32 %v758_v35, %v688_v31 }
  0xfb   : > { %v852_v40 = vadd.f32 %v811_v36, %v721_v38  ;;  %v853_v41 = vadd.f32 %v840_v37, %v750_v39 }
 0x101   : > { %v910_v42 = vpop.f32.mrf.mxu2  ;;  %v939_v43 = vpop.f32.mrf.mxu3 }
 0x102   : > { %v951_v44 = vadd.f32 %v910_v42, %v852_v40  ;;  %v952_v45 = vadd.f32 %v939_v43, %v853_v41  ;;  %v814_v48 = vpop.f32.mrf.mxu0  ;;  %v843_v49 = vpop.f32.mrf.mxu1 }
 0x103   : > { %v854_v52 = vadd.f32 %v814_v48, %v724_v50  ;;  %v855_v53 = vadd.f32 %v843_v49, %v753_v51 }
 0x104   : > { %959 = vst [vmem:[%s1907_s30 + $0x10] sm:$0xff] %v951_v44 }
 0x105   : > { %960 = vst [vmem:[%s1907_s30 + $0x18] sm:$0xff] %v952_v45 }
 0x109   : > { %v913_v54 = vpop.f32.mrf.mxu2  ;;  %v942_v55 = vpop.f32.mrf.mxu3 }
 0x10a   : > { %v953_v56 = vadd.f32 %v913_v54, %v854_v52  ;;  %v954_v57 = vadd.f32 %v942_v55, %v855_v53  ;;  %v817_v58 = vpop.f32.mrf.mxu0  ;;  %v846_v59 = vpop.f32.mrf.mxu1 }
 0x10b   : > { %v856_v32 = vadd.f32 %v817_v58, %v727_v62  ;;  %v857_v33 = vadd.f32 %v846_v59, %v756_v63 }
 0x10c   : > { %961 = vst [vmem:[%s1907_s30 + $0x30] sm:$0xff] %v953_v56 }
 0x10d   : > { %962 = vst [vmem:[%s1907_s30 + $0x38] sm:$0xff] %v954_v57 }
 0x111   : > { %v916_v46 = vpop.f32.mrf.mxu2  ;;  %v945_v47 = vpop.f32.mrf.mxu3 }
 0x112   : > { %v955_v60 = vadd.f32 %v916_v46, %v856_v32  ;;  %v956_v61 = vadd.f32 %v945_v47, %v857_v33  ;;  %v820_v0 = vpop.f32.mrf.mxu0  ;;  %v849_v1 = vpop.f32.mrf.mxu1 }
 0x113   : > { %v858_v4 = vadd.f32 %v820_v0, %v730_v2  ;;  %v859_v5 = vadd.f32 %v849_v1, %v759_v3 }
 0x114   : > { %963 = vst [vmem:[%s1907_s30 + $0x50] sm:$0xff] %v955_v60 }
 0x115   : > { %964 = vst [vmem:[%s1907_s30 + $0x58] sm:$0xff] %v956_v61 }
 0x119   : > { %v919_v6 = vpop.f32.mrf.mxu2  ;;  %v948_v7 = vpop.f32.mrf.mxu3 }
 0x11a   : > { %v957_v8 = vadd.f32 %v919_v6, %v858_v4  ;;  %v958_v9 = vadd.f32 %v948_v7, %v859_v5 }
 0x11c   : > { %965 = vst [vmem:[%s1907_s30 + $0x70] sm:$0xff] %v957_v8 }
 0x11d   : > { %966 = vst [vmem:[%s1907_s30 + $0x78] sm:$0xff] %v958_v9 }
 0x11e PF: > { %s12_s11 = sadd.s32 1, %s1310_s11   ;;  %s1943_s9 = smov %s1306_s10 }
 0x11f   : > { %p9_p5 = scmp.ge.s32.totalorder %s12_s11, 4   ;;  %s1944_s10 = smov %s1946_s12 }
 0x121   :  { %11 = sbr.rel (!%p9_p5) target bundleno = 2 (0x2), region = 68 }

</bundles_post_ra>
